<compile_context>
chip_gen: v7x
topology: tpu7x:2x2x1
jax: 0.10.0
libtpu: 0.0.40
codegen_flags: <defaults>
</compile_context>

<pallas_src>
import jax
import jax.numpy as jnp
from jax.experimental import pallas as pl
from jax.experimental.pallas import tpu as pltpu

C = 48          # channels (fixed by the module)
BN_EPS = 1e-5


# ---------------------------------------------------------------------------
# Kernels (all operate on lane-dense (C, HW_tile) tiles)
# ---------------------------------------------------------------------------
def _stats1_kernel(x_ref, w1_ref, st_ref):
    """y1 = W1 @ x ; emit per-tile [sum(y1), sum(y1^2)] per channel."""
    x = x_ref[0]                                                   # (C, HW_t)
    y = jnp.dot(w1_ref[...], x, preferred_element_type=jnp.float32)
    st_ref[0, 0] = jnp.concatenate(
        [jnp.sum(y, axis=1, keepdims=True),
         jnp.sum(y * y, axis=1, keepdims=True)], axis=1)           # (C, 2)


def _stats2_kernel(x_ref, w1_ref, s1_ref, t1_ref, w2_ref, st_ref):
    """Recompute y1, apply folded BN1 + relu, conv2; emit stats of y2."""
    x = x_ref[0]                                                   # (C, HW_t)
    y = jnp.dot(w1_ref[...], x, preferred_element_type=jnp.float32)
    z = jnp.maximum(y * s1_ref[...] + t1_ref[...], 0.0)            # folded BN1
    y2 = jnp.dot(w2_ref[...], z, preferred_element_type=jnp.float32)
    st_ref[0, 0] = jnp.concatenate(
        [jnp.sum(y2, axis=1, keepdims=True),
         jnp.sum(y2 * y2, axis=1, keepdims=True)], axis=1)         # (C, 2)


def _final_kernel(x_ref, w1_ref, s1_ref, t1_ref, w2_ref, s2_ref, t2_ref,
                  o_ref):
    """Full recompute, folded BN2, residual add."""
    x = x_ref[0]                                                   # (C, HW_t)
    y = jnp.dot(w1_ref[...], x, preferred_element_type=jnp.float32)
    z = jnp.maximum(y * s1_ref[...] + t1_ref[...], 0.0)            # folded BN1
    y2 = jnp.dot(w2_ref[...], z, preferred_element_type=jnp.float32)
    o_ref[0] = y2 * s2_ref[...] + t2_ref[...] + x                  # BN2 + res


# ---------------------------------------------------------------------------
# Wrapper
# ---------------------------------------------------------------------------
def _pick_hw_tile(hw, cap=2048):
    """Largest lane-dense (multiple-of-128) tile dividing hw, VMEM-capped."""
    if hw <= cap or hw % 128 != 0:
        return hw                       # full-extent block is always legal
    for t in range(cap - cap % 128, 0, -128):
        if hw % t == 0:
            return t
    return hw


def _fold_bn(stats, gamma, beta, m_total):
    """(N,T,C,2) partial sums -> per-channel (scale, shift) as (C,1)."""
    s = jnp.sum(stats, axis=(0, 1))                       # (C, 2)
    mu = s[:, 0] / m_total
    var = s[:, 1] / m_total - mu * mu                     # biased variance
    scale = gamma * jax.lax.rsqrt(var + BN_EPS)
    shift = beta - mu * scale
    return scale.reshape(C, 1), shift.reshape(C, 1)


def residual_block_pallas(x_nchw, params):
    """x_nchw: (N, 48, H, W) float32 -> (N, 48, H, W) float32."""
    w1, b1, g1, be1, w2, b2, g2, be2 = params
    # Conv biases cancel exactly under training-mode BN (mean subtraction),
    # so they are not used on the Pallas path.
    del b1, b2

    n, c, h, w = x_nchw.shape
    assert c == C
    hw = h * w
    x3 = x_nchw.reshape(n, c, hw)            # free view of contiguous NCHW
    hw_t = _pick_hw_tile(hw)
    t = hw // hw_t
    m_total = n * hw
    grid = (n, t)

    x_spec = pl.BlockSpec((1, C, hw_t), lambda i, j: (i, 0, j))
    w_spec = pl.BlockSpec((C, C), lambda i, j: (0, 0))
    v_spec = pl.BlockSpec((C, 1), lambda i, j: (0, 0))
    st_spec = pl.BlockSpec((1, 1, C, 2), lambda i, j: (i, j, 0, 0))
    cparams = pltpu.CompilerParams(
        dimension_semantics=("parallel", "parallel"))

    # ---- pass 1: conv1 + per-tile stats of y1 -----------------------------
    stats1 = pl.pallas_call(
        _stats1_kernel,
        out_shape=jax.ShapeDtypeStruct((n, t, C, 2), jnp.float32),
        grid=grid,
        in_specs=[x_spec, w_spec],
        out_specs=st_spec,
        compiler_params=cparams,
    )(x3, w1)
    scale1, shift1 = _fold_bn(stats1, g1, be1, m_total)

    # ---- pass 2: BN1 + relu + conv2 -> per-tile stats of y2 ----------------
    stats2 = pl.pallas_call(
        _stats2_kernel,
        out_shape=jax.ShapeDtypeStruct((n, t, C, 2), jnp.float32),
        grid=grid,
        in_specs=[x_spec, w_spec, v_spec, v_spec, w_spec],
        out_specs=st_spec,
        compiler_params=cparams,
    )(x3, w1, scale1, shift1, w2)
    scale2, shift2 = _fold_bn(stats2, g2, be2, m_total)

    # ---- pass 3: BN2 + residual -> output ----------------------------------
    out3 = pl.pallas_call(
        _final_kernel,
        out_shape=jax.ShapeDtypeStruct((n, C, hw), jnp.float32),
        grid=grid,
        in_specs=[x_spec, w_spec, v_spec, v_spec, w_spec, v_spec, v_spec],
        out_specs=x_spec,
        compiler_params=cparams,
    )(x3, w1, scale1, shift1, w2, scale2, shift2)

    return out3.reshape(n, c, h, w)


# ---------------------------------------------------------------------------
# Parameters & pure-JAX reference (PyTorch-equivalent, training-mode BN)
# ---------------------------------------------------------------------------
def make_params(key):
    k1, k2, k3, k4 = jax.random.split(key, 4)
    # Conv2d(48, 48, 1): weight (C_out, C_in) after squeezing 1x1, bias (C,)
    w1 = jax.random.normal(k1, (C, C), jnp.float32) * 0.05
    b1 = jax.random.normal(k2, (C,), jnp.float32) * 0.05
    w2 = jax.random.normal(k3, (C, C), jnp.float32) * 0.05
    b2 = jax.random.normal(k4, (C,), jnp.float32) * 0.05
    # BatchNorm2d(48): gamma=1, beta=0 (PyTorch defaults)
    g1 = jnp.ones((C,), jnp.float32)
    be1 = jnp.zeros((C,), jnp.float32)
    g2 = jnp.ones((C,), jnp.float32)
    be2 = jnp.zeros((C,), jnp.float32)
    return (w1, b1, g1, be1, w2, b2, g2, be2)


def _reference(x_nchw, params):
    """Straightforward JAX port of the PyTorch forward (with conv biases)."""
    w1, b1, g1, be1, w2, b2, g2, be2 = params
    n, c, h, w = x_nchw.shape
    x = x_nchw.reshape(n, c, h * w)

    def conv(v, wt, b):
        return jnp.einsum('oi,nip->nop', wt, v) + b[None, :, None]

    def bn(y, g, be):
        mu = jnp.mean(y, axis=(0, 2), keepdims=True)
        var = jnp.mean((y - mu) ** 2, axis=(0, 2), keepdims=True)
        return (y - mu) / jnp.sqrt(var + BN_EPS) * g[None, :, None] \
            + be[None, :, None]

    y = jnp.maximum(bn(conv(x, w1, b1), g1, be1), 0.0)
    y = bn(conv(y, w2, b2), g2, be2) + x
    return y.reshape(n, c, h, w)


if __name__ == "__main__":
    key = jax.random.PRNGKey(0)
    kx, kp = jax.random.split(key)

    # Module requires 48 channels; small N=2, 16x16 spatial.
    x = jax.random.normal(kx, (2, C, 16, 16), jnp.float32)
    params = make_params(kp)

    fwd = jax.jit(residual_block_pallas)
    out = jax.block_until_ready(fwd(x, params))

    ref = jax.block_until_ready(_reference(x, params))
    assert out.shape == x.shape and out.dtype == jnp.float32
    err = float(jnp.max(jnp.abs(out - ref)))
    assert err < 1e-4, f"mismatch vs reference: {err}"

    print("KERNEL_OK")
</pallas_src>

<mosaic_0001>
module attributes {stable_mosaic.version = 11 : i64} {
  func.func @_stats1_kernel(%arg0: i32, %arg1: i32, %arg2: memref<1x48x256xf32, #tpu.memory_space<vmem>>, %arg3: memref<48x48xf32, #tpu.memory_space<vmem>>, %arg4: memref<1x1x48x2xf32, #tpu.memory_space<vmem>>) attributes {dimension_semantics = [#tpu.dimension_semantics<parallel>, #tpu.dimension_semantics<parallel>], iteration_bounds = array<i64: 2, 1>, scalar_prefetch = 0 : i64, scratch_operands = 0 : i64, tpu.core_type = #tpu.core_type<tc>, window_params = [{transform_indices = @transform_0, window_bounds = array<i64: 1, 48, 256>}, {pipeline_mode = #tpu.pipeline_mode<synchronous>, transform_indices = @transform_1, window_bounds = array<i64: 48, 48>}, {transform_indices = @transform_2, window_bounds = array<i64: 1, 1, 48, 2>}]} {
    %c0 = arith.constant 0 : index
    %c0_0 = arith.constant 0 : index
    %c0_1 = arith.constant 0 : index
    %0 = vector.load %arg2[%c0, %c0_0, %c0_1] : memref<1x48x256xf32, #tpu.memory_space<vmem>>, vector<1x48x256xf32>
    %1 = vector.shape_cast %0 : vector<1x48x256xf32> to vector<48x256xf32>
    %c0_2 = arith.constant 0 : index
    %c0_3 = arith.constant 0 : index
    %2 = vector.load %arg3[%c0_2, %c0_3] : memref<48x48xf32, #tpu.memory_space<vmem>>, vector<48x48xf32>
    %cst = arith.constant dense<0.000000e+00> : vector<48x256xf32>
    %3 = tpu.matmul %2, %1, %cst {dimension_numbers = #tpu.dot_dimension_numbers<[1], [0], [0], [1], [0, 0, 1, 1], [], []>} : vector<48x48xf32>, vector<48x256xf32>, vector<48x256xf32> -> vector<48x256xf32>
    %cst_4 = arith.constant dense<0.000000e+00> : vector<48xf32>
    %4 = vector.multi_reduction <add>, %3, %cst_4 [1] : vector<48x256xf32> to vector<48xf32>
    %5 = vector.shape_cast %4 : vector<48xf32> to vector<48x1xf32>
    %6 = arith.mulf %3, %3 : vector<48x256xf32>
    %cst_5 = arith.constant dense<0.000000e+00> : vector<48xf32>
    %7 = vector.multi_reduction <add>, %6, %cst_5 [1] : vector<48x256xf32> to vector<48xf32>
    %8 = vector.shape_cast %7 : vector<48xf32> to vector<48x1xf32>
    %9 = tpu.concatenate %5, %8 in 1 : vector<48x1xf32>, vector<48x1xf32> -> vector<48x2xf32>
    %c0_6 = arith.constant 0 : index
    %c0_7 = arith.constant 0 : index
    %c0_8 = arith.constant 0 : index
    %c0_9 = arith.constant 0 : index
    %10 = vector.load %arg4[%c0_6, %c0_7, %c0_8, %c0_9] : memref<1x1x48x2xf32, #tpu.memory_space<vmem>>, vector<1x1x48x2xf32>
    %11 = vector.shape_cast %10 : vector<1x1x48x2xf32> to vector<48x2xf32>
    %12 = vector.shape_cast %9 : vector<48x2xf32> to vector<1x1x48x2xf32>
    tpu.vector_store %arg4[%c0_6, %c0_7, %c0_8, %c0_9], %12 {strides = array<i32>} : memref<1x1x48x2xf32, #tpu.memory_space<vmem>>, vector<1x1x48x2xf32>,
    return
  }
  func.func @transform_0(%arg0: i32, %arg1: i32) -> (i32, i32, i32) {
    %c0_i32 = arith.constant 0 : i32
    %c0_i32_0 = arith.constant 0 : i32
    return %arg0, %c0_i32, %arg1 : i32, i32, i32
  }
  func.func @transform_1(%arg0: i32, %arg1: i32) -> (i32, i32) {
    %c0_i32 = arith.constant 0 : i32
    %c0_i32_0 = arith.constant 0 : i32
    %c0_i32_1 = arith.constant 0 : i32
    return %c0_i32, %c0_i32_0 : i32, i32
  }
  func.func @transform_2(%arg0: i32, %arg1: i32) -> (i32, i32, i32, i32) {
    %c0_i32 = arith.constant 0 : i32
    %c0_i32_0 = arith.constant 0 : i32
    %c0_i32_1 = arith.constant 0 : i32
    return %arg0, %arg1, %c0_i32, %c0_i32_0 : i32, i32, i32, i32
  }
}

module attributes {stable_mosaic.version = 11 : i64} {
  func.func @_stats2_kernel(%arg0: i32, %arg1: i32, %arg2: memref<1x48x256xf32, #tpu.memory_space<vmem>>, %arg3: memref<48x48xf32, #tpu.memory_space<vmem>>, %arg4: memref<48x1xf32, #tpu.memory_space<vmem>>, %arg5: memref<48x1xf32, #tpu.memory_space<vmem>>, %arg6: memref<48x48xf32, #tpu.memory_space<vmem>>, %arg7: memref<1x1x48x2xf32, #tpu.memory_space<vmem>>) attributes {dimension_semantics = [#tpu.dimension_semantics<parallel>, #tpu.dimension_semantics<parallel>], iteration_bounds = array<i64: 2, 1>, scalar_prefetch = 0 : i64, scratch_operands = 0 : i64, tpu.core_type = #tpu.core_type<tc>, window_params = [{transform_indices = @transform_0, window_bounds = array<i64: 1, 48, 256>}, {pipeline_mode = #tpu.pipeline_mode<synchronous>, transform_indices = @transform_1, window_bounds = array<i64: 48, 48>}, {pipeline_mode = #tpu.pipeline_mode<synchronous>, transform_indices = @transform_2, window_bounds = array<i64: 48, 1>}, {pipeline_mode = #tpu.pipeline_mode<synchronous>, transform_indices = @transform_3, window_bounds = array<i64: 48, 1>}, {pipeline_mode = #tpu.pipeline_mode<synchronous>, transform_indices = @transform_4, window_bounds = array<i64: 48, 48>}, {transform_indices = @transform_5, window_bounds = array<i64: 1, 1, 48, 2>}]} {
    %c0 = arith.constant 0 : index
    %c0_0 = arith.constant 0 : index
    %c0_1 = arith.constant 0 : index
    %0 = vector.load %arg2[%c0, %c0_0, %c0_1] : memref<1x48x256xf32, #tpu.memory_space<vmem>>, vector<1x48x256xf32>
    %1 = vector.shape_cast %0 : vector<1x48x256xf32> to vector<48x256xf32>
    %c0_2 = arith.constant 0 : index
    %c0_3 = arith.constant 0 : index
    %2 = vector.load %arg3[%c0_2, %c0_3] : memref<48x48xf32, #tpu.memory_space<vmem>>, vector<48x48xf32>
    %cst = arith.constant dense<0.000000e+00> : vector<48x256xf32>
    %3 = tpu.matmul %2, %1, %cst {dimension_numbers = #tpu.dot_dimension_numbers<[1], [0], [0], [1], [0, 0, 1, 1], [], []>} : vector<48x48xf32>, vector<48x256xf32>, vector<48x256xf32> -> vector<48x256xf32>
    %c0_4 = arith.constant 0 : index
    %c0_5 = arith.constant 0 : index
    %4 = vector.load %arg4[%c0_4, %c0_5] : memref<48x1xf32, #tpu.memory_space<vmem>>, vector<48x1xf32>
    %5 = vector.broadcast %4 : vector<48x1xf32> to vector<48x256xf32>
    %6 = arith.mulf %3, %5 : vector<48x256xf32>
    %c0_6 = arith.constant 0 : index
    %c0_7 = arith.constant 0 : index
    %7 = vector.load %arg5[%c0_6, %c0_7] : memref<48x1xf32, #tpu.memory_space<vmem>>, vector<48x1xf32>
    %8 = vector.broadcast %7 : vector<48x1xf32> to vector<48x256xf32>
    %9 = arith.addf %6, %8 : vector<48x256xf32>
    %cst_8 = arith.constant 0.000000e+00 : f32
    %10 = vector.broadcast %cst_8 : f32 to vector<48x256xf32>
    %11 = arith.maximumf %9, %10 : vector<48x256xf32>
    %c0_9 = arith.constant 0 : index
    %c0_10 = arith.constant 0 : index
    %12 = vector.load %arg6[%c0_9, %c0_10] : memref<48x48xf32, #tpu.memory_space<vmem>>, vector<48x48xf32>
    %cst_11 = arith.constant dense<0.000000e+00> : vector<48x256xf32>
    %13 = tpu.matmul %12, %11, %cst_11 {dimension_numbers = #tpu.dot_dimension_numbers<[1], [0], [0], [1], [0, 0, 1, 1], [], []>} : vector<48x48xf32>, vector<48x256xf32>, vector<48x256xf32> -> vector<48x256xf32>
    %cst_12 = arith.constant dense<0.000000e+00> : vector<48xf32>
    %14 = vector.multi_reduction <add>, %13, %cst_12 [1] : vector<48x256xf32> to vector<48xf32>
    %15 = vector.shape_cast %14 : vector<48xf32> to vector<48x1xf32>
    %16 = arith.mulf %13, %13 : vector<48x256xf32>
    %cst_13 = arith.constant dense<0.000000e+00> : vector<48xf32>
    %17 = vector.multi_reduction <add>, %16, %cst_13 [1] : vector<48x256xf32> to vector<48xf32>
    %18 = vector.shape_cast %17 : vector<48xf32> to vector<48x1xf32>
    %19 = tpu.concatenate %15, %18 in 1 : vector<48x1xf32>, vector<48x1xf32> -> vector<48x2xf32>
    %c0_14 = arith.constant 0 : index
    %c0_15 = arith.constant 0 : index
    %c0_16 = arith.constant 0 : index
    %c0_17 = arith.constant 0 : index
    %20 = vector.load %arg7[%c0_14, %c0_15, %c0_16, %c0_17] : memref<1x1x48x2xf32, #tpu.memory_space<vmem>>, vector<1x1x48x2xf32>
    %21 = vector.shape_cast %20 : vector<1x1x48x2xf32> to vector<48x2xf32>
    %22 = vector.shape_cast %19 : vector<48x2xf32> to vector<1x1x48x2xf32>
    tpu.vector_store %arg7[%c0_14, %c0_15, %c0_16, %c0_17], %22 {strides = array<i32>} : memref<1x1x48x2xf32, #tpu.memory_space<vmem>>, vector<1x1x48x2xf32>,
    return
  }
  func.func @transform_0(%arg0: i32, %arg1: i32) -> (i32, i32, i32) {
    %c0_i32 = arith.constant 0 : i32
    %c0_i32_0 = arith.constant 0 : i32
    return %arg0, %c0_i32, %arg1 : i32, i32, i32
  }
  func.func @transform_1(%arg0: i32, %arg1: i32) -> (i32, i32) {
    %c0_i32 = arith.constant 0 : i32
    %c0_i32_0 = arith.constant 0 : i32
    %c0_i32_1 = arith.constant 0 : i32
    return %c0_i32, %c0_i32_0 : i32, i32
  }
  func.func @transform_2(%arg0: i32, %arg1: i32) -> (i32, i32) {
    %c0_i32 = arith.constant 0 : i32
    %c0_i32_0 = arith.constant 0 : i32
    %c0_i32_1 = arith.constant 0 : i32
    return %c0_i32, %c0_i32_0 : i32, i32
  }
  func.func @transform_3(%arg0: i32, %arg1: i32) -> (i32, i32) {
    %c0_i32 = arith.constant 0 : i32
    %c0_i32_0 = arith.constant 0 : i32
    %c0_i32_1 = arith.constant 0 : i32
    return %c0_i32, %c0_i32_0 : i32, i32
  }
  func.func @transform_4(%arg0: i32, %arg1: i32) -> (i32, i32) {
    %c0_i32 = arith.constant 0 : i32
    %c0_i32_0 = arith.constant 0 : i32
    %c0_i32_1 = arith.constant 0 : i32
    return %c0_i32, %c0_i32_0 : i32, i32
  }
  func.func @transform_5(%arg0: i32, %arg1: i32) -> (i32, i32, i32, i32) {
    %c0_i32 = arith.constant 0 : i32
    %c0_i32_0 = arith.constant 0 : i32
    %c0_i32_1 = arith.constant 0 : i32
    return %arg0, %arg1, %c0_i32, %c0_i32_0 : i32, i32, i32, i32
  }
}

module attributes {stable_mosaic.version = 11 : i64} {
  func.func @_final_kernel(%arg0: i32, %arg1: i32, %arg2: memref<1x48x256xf32, #tpu.memory_space<vmem>>, %arg3: memref<48x48xf32, #tpu.memory_space<vmem>>, %arg4: memref<48x1xf32, #tpu.memory_space<vmem>>, %arg5: memref<48x1xf32, #tpu.memory_space<vmem>>, %arg6: memref<48x48xf32, #tpu.memory_space<vmem>>, %arg7: memref<48x1xf32, #tpu.memory_space<vmem>>, %arg8: memref<48x1xf32, #tpu.memory_space<vmem>>, %arg9: memref<1x48x256xf32, #tpu.memory_space<vmem>>) attributes {dimension_semantics = [#tpu.dimension_semantics<parallel>, #tpu.dimension_semantics<parallel>], iteration_bounds = array<i64: 2, 1>, scalar_prefetch = 0 : i64, scratch_operands = 0 : i64, tpu.core_type = #tpu.core_type<tc>, window_params = [{transform_indices = @transform_0, window_bounds = array<i64: 1, 48, 256>}, {pipeline_mode = #tpu.pipeline_mode<synchronous>, transform_indices = @transform_1, window_bounds = array<i64: 48, 48>}, {pipeline_mode = #tpu.pipeline_mode<synchronous>, transform_indices = @transform_2, window_bounds = array<i64: 48, 1>}, {pipeline_mode = #tpu.pipeline_mode<synchronous>, transform_indices = @transform_3, window_bounds = array<i64: 48, 1>}, {pipeline_mode = #tpu.pipeline_mode<synchronous>, transform_indices = @transform_4, window_bounds = array<i64: 48, 48>}, {pipeline_mode = #tpu.pipeline_mode<synchronous>, transform_indices = @transform_5, window_bounds = array<i64: 48, 1>}, {pipeline_mode = #tpu.pipeline_mode<synchronous>, transform_indices = @transform_6, window_bounds = array<i64: 48, 1>}, {transform_indices = @transform_7, window_bounds = array<i64: 1, 48, 256>}]} {
    %c0 = arith.constant 0 : index
    %c0_0 = arith.constant 0 : index
    %c0_1 = arith.constant 0 : index
    %0 = vector.load %arg2[%c0, %c0_0, %c0_1] : memref<1x48x256xf32, #tpu.memory_space<vmem>>, vector<1x48x256xf32>
    %1 = vector.shape_cast %0 : vector<1x48x256xf32> to vector<48x256xf32>
    %c0_2 = arith.constant 0 : index
    %c0_3 = arith.constant 0 : index
    %2 = vector.load %arg3[%c0_2, %c0_3] : memref<48x48xf32, #tpu.memory_space<vmem>>, vector<48x48xf32>
    %cst = arith.constant dense<0.000000e+00> : vector<48x256xf32>
    %3 = tpu.matmul %2, %1, %cst {dimension_numbers = #tpu.dot_dimension_numbers<[1], [0], [0], [1], [0, 0, 1, 1], [], []>} : vector<48x48xf32>, vector<48x256xf32>, vector<48x256xf32> -> vector<48x256xf32>
    %c0_4 = arith.constant 0 : index
    %c0_5 = arith.constant 0 : index
    %4 = vector.load %arg4[%c0_4, %c0_5] : memref<48x1xf32, #tpu.memory_space<vmem>>, vector<48x1xf32>
    %5 = vector.broadcast %4 : vector<48x1xf32> to vector<48x256xf32>
    %6 = arith.mulf %3, %5 : vector<48x256xf32>
    %c0_6 = arith.constant 0 : index
    %c0_7 = arith.constant 0 : index
    %7 = vector.load %arg5[%c0_6, %c0_7] : memref<48x1xf32, #tpu.memory_space<vmem>>, vector<48x1xf32>
    %8 = vector.broadcast %7 : vector<48x1xf32> to vector<48x256xf32>
    %9 = arith.addf %6, %8 : vector<48x256xf32>
    %cst_8 = arith.constant 0.000000e+00 : f32
    %10 = vector.broadcast %cst_8 : f32 to vector<48x256xf32>
    %11 = arith.maximumf %9, %10 : vector<48x256xf32>
    %c0_9 = arith.constant 0 : index
    %c0_10 = arith.constant 0 : index
    %12 = vector.load %arg6[%c0_9, %c0_10] : memref<48x48xf32, #tpu.memory_space<vmem>>, vector<48x48xf32>
    %cst_11 = arith.constant dense<0.000000e+00> : vector<48x256xf32>
    %13 = tpu.matmul %12, %11, %cst_11 {dimension_numbers = #tpu.dot_dimension_numbers<[1], [0], [0], [1], [0, 0, 1, 1], [], []>} : vector<48x48xf32>, vector<48x256xf32>, vector<48x256xf32> -> vector<48x256xf32>
    %c0_12 = arith.constant 0 : index
    %c0_13 = arith.constant 0 : index
    %14 = vector.load %arg7[%c0_12, %c0_13] : memref<48x1xf32, #tpu.memory_space<vmem>>, vector<48x1xf32>
    %15 = vector.broadcast %14 : vector<48x1xf32> to vector<48x256xf32>
    %16 = arith.mulf %13, %15 : vector<48x256xf32>
    %c0_14 = arith.constant 0 : index
    %c0_15 = arith.constant 0 : index
    %17 = vector.load %arg8[%c0_14, %c0_15] : memref<48x1xf32, #tpu.memory_space<vmem>>, vector<48x1xf32>
    %18 = vector.broadcast %17 : vector<48x1xf32> to vector<48x256xf32>
    %19 = arith.addf %16, %18 : vector<48x256xf32>
    %20 = arith.addf %19, %1 : vector<48x256xf32>
    %c0_16 = arith.constant 0 : index
    %c0_17 = arith.constant 0 : index
    %c0_18 = arith.constant 0 : index
    %21 = vector.load %arg9[%c0_16, %c0_17, %c0_18] : memref<1x48x256xf32, #tpu.memory_space<vmem>>, vector<1x48x256xf32>
    %22 = vector.shape_cast %21 : vector<1x48x256xf32> to vector<48x256xf32>
    %23 = vector.shape_cast %20 : vector<48x256xf32> to vector<1x48x256xf32>
    tpu.vector_store %arg9[%c0_16, %c0_17, %c0_18], %23 {strides = array<i32>} : memref<1x48x256xf32, #tpu.memory_space<vmem>>, vector<1x48x256xf32>,
    return
  }
  func.func @transform_0(%arg0: i32, %arg1: i32) -> (i32, i32, i32) {
    %c0_i32 = arith.constant 0 : i32
    %c0_i32_0 = arith.constant 0 : i32
    return %arg0, %c0_i32, %arg1 : i32, i32, i32
  }
  func.func @transform_1(%arg0: i32, %arg1: i32) -> (i32, i32) {
    %c0_i32 = arith.constant 0 : i32
    %c0_i32_0 = arith.constant 0 : i32
    %c0_i32_1 = arith.constant 0 : i32
    return %c0_i32, %c0_i32_0 : i32, i32
  }
  func.func @transform_2(%arg0: i32, %arg1: i32) -> (i32, i32) {
    %c0_i32 = arith.constant 0 : i32
    %c0_i32_0 = arith.constant 0 : i32
    %c0_i32_1 = arith.constant 0 : i32
    return %c0_i32, %c0_i32_0 : i32, i32
  }
  func.func @transform_3(%arg0: i32, %arg1: i32) -> (i32, i32) {
    %c0_i32 = arith.constant 0 : i32
    %c0_i32_0 = arith.constant 0 : i32
    %c0_i32_1 = arith.constant 0 : i32
    return %c0_i32, %c0_i32_0 : i32, i32
  }
  func.func @transform_4(%arg0: i32, %arg1: i32) -> (i32, i32) {
    %c0_i32 = arith.constant 0 : i32
    %c0_i32_0 = arith.constant 0 : i32
    %c0_i32_1 = arith.constant 0 : i32
    return %c0_i32, %c0_i32_0 : i32, i32
  }
  func.func @transform_5(%arg0: i32, %arg1: i32) -> (i32, i32) {
    %c0_i32 = arith.constant 0 : i32
    %c0_i32_0 = arith.constant 0 : i32
    %c0_i32_1 = arith.constant 0 : i32
    return %c0_i32, %c0_i32_0 : i32, i32
  }
  func.func @transform_6(%arg0: i32, %arg1: i32) -> (i32, i32) {
    %c0_i32 = arith.constant 0 : i32
    %c0_i32_0 = arith.constant 0 : i32
    %c0_i32_1 = arith.constant 0 : i32
    return %c0_i32, %c0_i32_0 : i32, i32
  }
  func.func @transform_7(%arg0: i32, %arg1: i32) -> (i32, i32, i32) {
    %c0_i32 = arith.constant 0 : i32
    %c0_i32_0 = arith.constant 0 : i32
    return %arg0, %c0_i32, %arg1 : i32, i32, i32
  }
}

</mosaic_0001>

<bundles_post_ra>
// kernel: residual_block_pallas.3
= control target key start
LH: loop header
LB: loop body
LE: loop exit
PB: predicated region body
PF: predicated region fallthrough
CT: control target
= control target key end

     0   :  { %s571_s9 = smov 0   ;;  %s573_s10 = smov 0   ;;  %s638_s0 = inlined_call_operand.vmem [shape: f32[2,48,256], index: 0, kind: input, shape index: {}]   ;;  %s639_s1 = inlined_call_operand.vmem [shape: f32[48,48], index: 1, kind: input, shape index: {}]   ;;  %s640_s2 = inlined_call_operand.vmem [shape: f32[2,1,48,2], index: 2, kind: output, shape index: {}]  }
   0x1   :  { %s575_s11 = smov 0  }
   0x2 LB: > { %s24_s12 = sadd.s32 1, %s549_s10  ;;  %p475_p0 = scmp.ge.s32.totalorder %s553_s11, 1  ;;  %s553_s11 = sphi %s575_s11, %s12_s11   ;;  %s549_s10 = sphi %s573_s10, %s642_s10   ;;  %s545_s9 = sphi %s571_s9, %s641_s9  }
   0x3   : > { %p26_p1 = scmp.ge.s32.totalorder %s24_s12, 2  ;;  %p133_p2 = scmp.lt.s32.totalorder %s553_s11, 3 }
   0x5   : > { %s644_s12 = smov (%p26_p1, %s24_s12), 0  ;;  %p134_p3 = pnand %p475_p0, %p133_p2 }
   0x6   : > { %p164_p4 = scmp.lt.s32.totalorder (!%p134_p3), %s545_s9, 1  ;;  %v555_v0 = vmov (!%p134_p3), 0.0   ;;  %v194_v19 = vld [vmem:[%s639_s1] sm:$0xff] (!%p134_p3)  ;;  %vm200_vm0 = vcmask (!%p134_p3), 392192   ;;  %v197_v20 = vld [vmem:[%s639_s1 + $0x18] sm:$0xff] (!%p134_p3)  ;;  %v195_v21 = vld [vmem:[%s639_s1 + $0x8] sm:$0xff] (!%p134_p3) }
   0x7   : > { %137 = sbr.rel (%p134_p3) target bundleno = 412 (0x19c), region = 28  ;;  %283 = vmatprep.mubr.f32.mxu0 (!%p134_p3), %v555_v0  ;;  %301 = vmatprep.mubr.f32.mxu1 (!%p134_p3), %v555_v0  ;;  %v198_v22 = vld [vmem:[%s639_s1 + $0x20] sm:$0xff] (!%p134_p3)  ;;  %v196_v23 = vld [vmem:[%s639_s1 + $0x10] sm:$0xff] (!%p134_p3)  ;;  %v199_v24 = vld [vmem:[%s639_s1 + $0x28] sm:$0xff] (!%p134_p3)  ;;  %vm368_vm1 = vcmask (!%p134_p3), 7168   ;;  %vm375_vm2 = vcmask (!%p134_p3), 15360  }
   0xe   : > { %s646_s9 = smov (!%p164_p4, %s545_s9), 1 }
   0xf   : > { %s504_s13 = smul.u32 96, %s646_s9 }
  0x10   : > { %s505_s29 = smul.u32 48, %s646_s9 }
  0x11   : > { %s171_s16 = scalar_lea.vmem %s638_s0, %s504_s13 }
  0x12   : > { %v183_v1 = vld [vmem:[%s171_s16 + $0x8] sm:$0xff]  ;;  %v185_v2 = vld [vmem:[%s171_s16 + $0x18] sm:$0xff]  ;;  %v182_v3 = vld [vmem:[%s171_s16] sm:$0xff]  ;;  %s181_s4 = scalar_lea.vmem %s640_s2, %s505_s29 }
  0x13   : > { %v486_v4 = vpack.c.bf16 %v185_v2, %v183_v1  ;;  %v184_v5 = vld [vmem:[%s171_s16 + $0x10] sm:$0xff]  ;;  %v187_v6 = vld [vmem:[%s171_s16 + $0x28] sm:$0xff]  ;;  %v189_v7 = vld [vmem:[%s171_s16 + $0x38] sm:$0xff] }
  0x14   : > { %v488_v8 = vpack.c.bf16 %v184_v5, %v182_v3  ;;  %v490_v9 = vpack.c.bf16 %v189_v7, %v187_v6  ;;  %v186_v10 = vld [vmem:[%s171_s16 + $0x20] sm:$0xff]  ;;  %v188_v11 = vld [vmem:[%s171_s16 + $0x30] sm:$0xff]  ;;  %v191_v12 = vld [vmem:[%s171_s16 + $0x48] sm:$0xff] }
  0x15   : > { %487 = vmatprep.subr.bf16.mxu0 %v486_v4  ;;  %498 = vmatprep.subr.bf16.mxu1 %v486_v4  ;;  %v193_v13 = vld [vmem:[%s171_s16 + $0x58] sm:$0xff]  ;;  %v492_v14 = vpack.c.bf16 %v188_v11, %v186_v10  ;;  %v190_v16 = vld [vmem:[%s171_s16 + $0x40] sm:$0xff]  ;;  %v192_v17 = vld [vmem:[%s171_s16 + $0x50] sm:$0xff] }
  0x16   : > { %489 = vmatpush1.bf16.msra.mxu0 %v488_v8  ;;  %501 = vmatpush1.bf16.msra.mxu1 %v488_v8  ;;  %v494_v15 = vpack.c.bf16 %v193_v13, %v191_v12  ;;  %v496_v18 = vpack.c.bf16 %v192_v17, %v190_v16 }
  0x17   : > { %491 = vmatprep.subr.bf16.mxu0 %v490_v9  ;;  %499 = vmatprep.subr.bf16.mxu1 %v490_v9 }
  0x1a   : > { %493 = vmatpush1.bf16.msra.mxu0 %v492_v14  ;;  %502 = vmatpush1.bf16.msra.mxu1 %v492_v14 }
  0x1b   : > { %495 = vmatprep.subr.bf16.mxu0 %v494_v15  ;;  %500 = vmatprep.subr.bf16.mxu1 %v494_v15 }
  0x1e   : > { %497 = vmatpush1.bf16.msra.mxu0 %v496_v18  ;;  %503 = vmatpush1.bf16.msra.mxu1 %v496_v18 }
  0x21   : > { %478 = vmatmul.mubr.msk.f32.vlgmr.msra.gmra.mrb[0].mxu0 %vm200_vm0, %v194_v19  ;;  %481 = vmatmul.mubr.msk.f32.vlgmr.msra.gmra.mrb[0].mxu1 %vm200_vm0, %v197_v20 }
  0x22   : > { %289 = vmatprep.mubr.f32.mxu0 %v555_v0  ;;  %307 = vmatprep.mubr.f32.mxu1 %v555_v0 }
  0x25   : > { %479 = vmatmul.mubr.msk.f32.gmra.mrb[2].mxu0 %vm200_vm0, %v195_v21  ;;  %482 = vmatmul.mubr.msk.f32.gmra.mrb[2].mxu1 %vm200_vm0, %v198_v22 }
  0x26   : > { %295 = vmatprep.mubr.f32.mxu0 %v555_v0  ;;  %313 = vmatprep.mubr.f32.mxu1 %v555_v0 }
  0x29   : > { %480 = vmatmul.mubr.msk.f32.gmra.mrb[4].mxu0 %vm200_vm0, %v196_v23  ;;  %483 = vmatmul.mubr.msk.f32.gmra.mrb[4].mxu1 %vm200_vm0, %v199_v24 }
  0xf4   : > { %v285_v25 = vpop.f32.mrb[0].mxu0  ;;  %v303_v26 = vpop.f32.mrb[0].mxu1 }
  0xf5   : > { %v338_v27 = vmul.f32 %v285_v25, %v285_v25  ;;  %v344_v28 = vmul.f32 %v303_v26, %v303_v26  ;;  %v287_v29 = vpop.f32.mrb[1].mxu0  ;;  %v305_v30 = vpop.f32.mrb[1].mxu1 }
  0xf6   : > { %v339_v31 = vmul.f32 %v287_v29, %v287_v29  ;;  %v345_v32 = vmul.f32 %v305_v30, %v305_v30  ;;  %v329_v33 = vadd.f32 %v305_v30, %v303_v26  ;;  %v320_v34 = vadd.f32 %v287_v29, %v285_v25 }
  0xf8   : > { %330 = vadd.xlane.f32.xlu1 %v329_v33  ;;  %321 = vadd.xlane.f32.xlu0 %v320_v34  ;;  %v291_v35 = vpop.f32.mrb[2].mxu0  ;;  %v359_v36 = vadd.f32 %v345_v32, %v344_v28  ;;  %v350_v37 = vadd.f32 %v339_v31, %v338_v27  ;;  %v309_v38 = vpop.f32.mrb[2].mxu1 }
  0xf9   : > { %v340_v39 = vmul.f32 %v291_v35, %v291_v35  ;;  %v293_v40 = vpop.f32.mrb[3].mxu0  ;;  %v346_v41 = vmul.f32 %v309_v38, %v309_v38  ;;  %v311_v42 = vpop.f32.mrb[3].mxu1 }
  0xfa   : > { %v341_v43 = vmul.f32 %v293_v40, %v293_v40  ;;  %v347_v44 = vmul.f32 %v311_v42, %v311_v42  ;;  %v323_v45 = vadd.f32 %v293_v40, %v291_v35  ;;  %v332_v46 = vadd.f32 %v311_v42, %v309_v38 }
  0xfc   : > { %360 = vadd.xlane.f32.xlu1 %v359_v36  ;;  %351 = vadd.xlane.f32.xlu0 %v350_v37  ;;  %v297_v47 = vpop.f32.mrb[4].mxu0  ;;  %v353_v48 = vadd.f32 %v341_v43, %v340_v39  ;;  %v315_v49 = vpop.f32.mrb[4].mxu1  ;;  %v362_v50 = vadd.f32 %v347_v44, %v346_v41 }
  0xfd   : > { %v342_v51 = vmul.f32 %v297_v47, %v297_v47  ;;  %v299_v52 = vpop.f32.mrb[5].mxu0  ;;  %v348_v53 = vmul.f32 %v315_v49, %v315_v49  ;;  %v317_v54 = vpop.f32.mrb[5].mxu1 }
  0xfe   : > { %v326_v55 = vadd.f32 %v299_v52, %v297_v47  ;;  %v343_v56 = vmul.f32 %v299_v52, %v299_v52  ;;  %v335_v57 = vadd.f32 %v317_v54, %v315_v49  ;;  %v349_v58 = vmul.f32 %v317_v54, %v317_v54 }
 0x100   : > { %354 = vadd.xlane.f32.xlu1 %v353_v48  ;;  %324 = vadd.xlane.f32.xlu0 %v323_v45  ;;  %v356_v59 = vadd.f32 %v343_v56, %v342_v51  ;;  %v365_v60 = vadd.f32 %v349_v58, %v348_v53 }
 0x104   : > { %333 = vadd.xlane.f32.xlu0 %v332_v46  ;;  %327 = vadd.xlane.f32.xlu1 %v326_v55 }
 0x108   : > { %357 = vadd.xlane.f32.xlu0 %v356_v59  ;;  %336 = vadd.xlane.f32.xlu1 %v335_v57 }
 0x10c   : > { %363 = vadd.xlane.f32.xlu0 %v362_v50  ;;  %366 = vadd.xlane.f32.xlu1 %v365_v60 }
 0x185   : > { %v331_v61 = vpop.xlane.xlu1 %330  ;;  %v322_v62 = vpop.xlane.xlu0 %321 }
 0x189   : > { %v361_v63 = vpop.xlane.xlu1 %360  ;;  %v352_v0 = vpop.xlane.xlu0 %351 }
 0x18a   : > { %v372_v1 = vsel %vm368_vm1, %v331_v61, %v361_v63  ;;  %v369_v2 = vsel %vm368_vm1, %v322_v62, %v352_v0 }
 0x18b   : > { %379 = vst.msk [vmem:[%s181_s4 + $0x18] sm:$0xff] %vm375_vm2, %v372_v1  ;;  %376 = vst.msk [vmem:[%s181_s4] sm:$0xff] %vm375_vm2, %v369_v2 }
 0x18d   : > { %v355_v3 = vpop.xlane.xlu1 %354  ;;  %v325_v4 = vpop.xlane.xlu0 %324 }
 0x18e   : > { %v370_v5 = vsel %vm368_vm1, %v325_v4, %v355_v3 }
 0x18f   : > { %377 = vst.msk [vmem:[%s181_s4 + $0x8] sm:$0xff] %vm375_vm2, %v370_v5 }
 0x191   : > { %v334_v6 = vpop.xlane.xlu0 %333  ;;  %v328_v7 = vpop.xlane.xlu1 %327 }
 0x195   : > { %v358_v8 = vpop.xlane.xlu0 %357  ;;  %v337_v9 = vpop.xlane.xlu1 %336 }
 0x196   : > { %v371_v10 = vsel %vm368_vm1, %v328_v7, %v358_v8 }
 0x197   : > { %378 = vst.msk [vmem:[%s181_s4 + $0x10] sm:$0xff] %vm375_vm2, %v371_v10 }
 0x199   : > { %v364_v11 = vpop.xlane.xlu0 %363  ;;  %v367_v12 = vpop.xlane.xlu1 %366 }
 0x19a   : > { %v373_v13 = vsel %vm368_vm1, %v334_v6, %v364_v11  ;;  %v374_v14 = vsel %vm368_vm1, %v337_v9, %v367_v12 }
 0x19b   : > { %380 = vst.msk [vmem:[%s181_s4 + $0x20] sm:$0xff] %vm375_vm2, %v373_v13  ;;  %381 = vst.msk [vmem:[%s181_s4 + $0x28] sm:$0xff] %vm375_vm2, %v374_v14 }
 0x19c PF: > { %s12_s11 = sadd.s32 1, %s553_s11   ;;  %s641_s9 = smov %s549_s10 }
 0x19d   : > { %p9_p5 = scmp.ge.s32.totalorder %s12_s11, 4   ;;  %s642_s10 = smov %s644_s12 }
 0x19f   :  { %11 = sbr.rel (!%p9_p5) target bundleno = 2 (0x2), region = 58 }

// kernel: residual_block_pallas.4
= control target key start
LH: loop header
LB: loop body
LE: loop exit
PB: predicated region body
PF: predicated region fallthrough
CT: control target
= control target key end

     0   :  { %s916_s18 = smov 0   ;;  %s918_s19 = smov 0   ;;  %s1061_s0 = inlined_call_operand.vmem [shape: f32[2,48,256], index: 0, kind: input, shape index: {}]   ;;  %s1062_s1 = inlined_call_operand.vmem [shape: f32[48,48], index: 1, kind: input, shape index: {}]   ;;  %s1063_s2 = inlined_call_operand.vmem [shape: f32[48,1], index: 2, kind: input, shape index: {}]   ;;  %s1064_s3 = inlined_call_operand.vmem [shape: f32[48,1], index: 3, kind: input, shape index: {}]   ;;  %s1065_s4 = inlined_call_operand.vmem [shape: f32[48,48], index: 4, kind: input, shape index: {}]   ;;  %s1066_s5 = inlined_call_operand.vmem [shape: f32[2,1,48,2], index: 5, kind: output, shape index: {}]  }
   0x1   :  { %s920_s20 = smov 0  }
   0x2 LB: > { %s27_s21 = sadd.s32 1, %s878_s19  ;;  %p789_p0 = scmp.ge.s32.totalorder %s882_s20, 1  ;;  %s882_s20 = sphi %s920_s20, %s15_s20   ;;  %s878_s19 = sphi %s918_s19, %s1068_s19   ;;  %s874_s18 = sphi %s916_s18, %s1067_s18  }
   0x3   : > { %p29_p1 = scmp.ge.s32.totalorder %s27_s21, 2  ;;  %p208_p2 = scmp.lt.s32.totalorder %s882_s20, 3 }
   0x5   : > { %s1070_s21 = smov (%p29_p1, %s27_s21), 0  ;;  %p209_p3 = pnand %p789_p0, %p208_p2 }
   0x6   : > { %p245_p4 = scmp.lt.s32.totalorder (!%p209_p3), %s874_s18, 1  ;;  %v884_v0 = vmov (!%p209_p3), 0.0   ;;  %v885_v1 = vmov (!%p209_p3), 0   ;;  %v449_v2 = vld [vmem:[%s1064_s3] sm:$0xff] (!%p209_p3)  ;;  %v450_v4 = vld [vmem:[%s1064_s3 + $0x8] sm:$0xff] (!%p209_p3)  ;;  %v404_v6 = vld [vmem:[%s1063_s2 + $0x18] sm:$0xff] (!%p209_p3) }
   0x7   : > { %212 = sbr.rel (%p209_p3) target bundleno = 663 (0x297), region = 40  ;;  %364 = vmatprep.mubr.f32.mxu0 (!%p209_p3), %v884_v0  ;;  %597 = vmatprep.mubr.f32.mxu1 (!%p209_p3), %v884_v0  ;;  %v401_v3 = vld [vmem:[%s1063_s2] sm:$0xff] (!%p209_p3)  ;;  %v402_v5 = vld [vmem:[%s1063_s2 + $0x8] sm:$0xff] (!%p209_p3)  ;;  %v403_v10 = vld [vmem:[%s1063_s2 + $0x10] sm:$0xff] (!%p209_p3)  ;;  %vm281_vm0 = vcmask (!%p209_p3), 392192   ;;  %vm682_vm1 = vcmask (!%p209_p3), 7168  }
   0x8   : > { %859 = vset.pattern.permute.xlu1 (!%p209_p3), %v885_v1  ;;  %858 = vset.pattern.permute.xlu0 (!%p209_p3), %v885_v1  ;;  %v452_v25 = vld [vmem:[%s1064_s3 + $0x18] sm:$0xff] (!%p209_p3)  ;;  %v451_v26 = vld [vmem:[%s1064_s3 + $0x10] sm:$0xff] (!%p209_p3)  ;;  %v406_v28 = vld [vmem:[%s1063_s2 + $0x28] sm:$0xff] (!%p209_p3)  ;;  %vm689_vm2 = vcmask (!%p209_p3), 15360  }
   0x9   : > { %457 = vperm.xlu1 (!%p209_p3), %859, %v449_v2   ;;  %409 = vperm.xlu0 (!%p209_p3), %858, %v401_v3   ;;  %v405_v29 = vld [vmem:[%s1063_s2 + $0x20] sm:$0xff] (!%p209_p3)  ;;  %v454_v31 = vld [vmem:[%s1064_s3 + $0x28] sm:$0xff] (!%p209_p3)  ;;  %v277_v34 = vld [vmem:[%s1062_s1 + $0x10] sm:$0xff] (!%p209_p3) }
   0xa   : > { %v275_v30 = vld [vmem:[%s1062_s1] sm:$0xff] (!%p209_p3)  ;;  %v276_v33 = vld [vmem:[%s1062_s1 + $0x8] sm:$0xff] (!%p209_p3)  ;;  %v278_v35 = vld [vmem:[%s1062_s1 + $0x18] sm:$0xff] (!%p209_p3) }
   0xb   : > { %v453_v32 = vld [vmem:[%s1064_s3 + $0x20] sm:$0xff] (!%p209_p3)  ;;  %v280_v37 = vld [vmem:[%s1062_s1 + $0x28] sm:$0xff] (!%p209_p3) }
   0xc   : > { %v279_v36 = vld [vmem:[%s1062_s1 + $0x20] sm:$0xff] (!%p209_p3) }
   0xd   : > { %462 = vperm.xlu1 (!%p209_p3), %859, %v450_v4   ;;  %414 = vperm.xlu0 (!%p209_p3), %858, %v402_v5  }
   0xe   : > { %s1072_s18 = smov (!%p245_p4, %s874_s18), 1 }
   0xf   : > { %s830_s26 = smul.u32 96, %s1072_s18 }
  0x10   : > { %s831_s7 = smul.u32 48, %s1072_s18 }
  0x11   : > { %s252_s8 = scalar_lea.vmem %s1061_s0, %s830_s26  ;;  %424 = vperm.xlu1 %859, %v404_v6   ;;  %419 = vperm.xlu0 %858, %v403_v10  }
  0x12   : > { %v264_v7 = vld [vmem:[%s252_s8 + $0x8] sm:$0xff]  ;;  %v266_v8 = vld [vmem:[%s252_s8 + $0x18] sm:$0xff]  ;;  %v263_v9 = vld [vmem:[%s252_s8] sm:$0xff]  ;;  %s262_s10 = scalar_lea.vmem %s1066_s5, %s831_s7 }
  0x13   : > { %v806_v11 = vpack.c.bf16 %v266_v8, %v264_v7  ;;  %v265_v12 = vld [vmem:[%s252_s8 + $0x10] sm:$0xff]  ;;  %v268_v13 = vld [vmem:[%s252_s8 + $0x28] sm:$0xff]  ;;  %v270_v14 = vld [vmem:[%s252_s8 + $0x38] sm:$0xff] }
  0x14   : > { %v808_v15 = vpack.c.bf16 %v265_v12, %v263_v9  ;;  %v810_v16 = vpack.c.bf16 %v270_v14, %v268_v13  ;;  %v267_v17 = vld [vmem:[%s252_s8 + $0x20] sm:$0xff]  ;;  %v269_v18 = vld [vmem:[%s252_s8 + $0x30] sm:$0xff]  ;;  %v272_v19 = vld [vmem:[%s252_s8 + $0x48] sm:$0xff] }
  0x15   : > { %807 = vmatprep.subr.bf16.mxu0 %v806_v11  ;;  %v274_v20 = vld [vmem:[%s252_s8 + $0x58] sm:$0xff]  ;;  %v812_v21 = vpack.c.bf16 %v269_v18, %v267_v17  ;;  %v271_v23 = vld [vmem:[%s252_s8 + $0x40] sm:$0xff]  ;;  %v273_v24 = vld [vmem:[%s252_s8 + $0x50] sm:$0xff]  ;;  %472 = vperm.xlu1 %859, %v452_v25  }
  0x16   : > { %809 = vmatpush1.bf16.msra.mxu0 %v808_v15  ;;  %v814_v22 = vpack.c.bf16 %v274_v20, %v272_v19  ;;  %v816_v27 = vpack.c.bf16 %v273_v24, %v271_v23  ;;  %467 = vperm.xlu0 %858, %v451_v26  }
  0x17   : > { %811 = vmatprep.subr.bf16.mxu0 %v810_v16 }
  0x19   : > { %434 = vperm.xlu1 %859, %v406_v28  }
  0x1a   : > { %813 = vmatpush1.bf16.msra.mxu0 %v812_v21  ;;  %429 = vperm.xlu0 %858, %v405_v29  }
  0x1b   : > { %815 = vmatprep.subr.bf16.mxu0 %v814_v22 }
  0x1d   : > { %482 = vperm.xlu1 %859, %v454_v31  }
  0x1e   : > { %817 = vmatpush1.bf16.msra.mxu0 %v816_v27  ;;  %477 = vperm.xlu0 %858, %v453_v32  }
  0x21   : > { %792 = vmatmul.mubr.msk.f32.vlgmr.msra.gmra.mrb[0].mxu0 %vm281_vm0, %v275_v30 }
  0x22   : > { %370 = vmatprep.mubr.f32.mxu0 %v884_v0 }
  0x25   : > { %793 = vmatmul.mubr.msk.f32.gmra.mrb[2].mxu0 %vm281_vm0, %v276_v33 }
  0x26   : > { %376 = vmatprep.mubr.f32.mxu0 %v884_v0 }
  0x29   : > { %794 = vmatmul.mubr.msk.f32.gmra.mrb[4].mxu0 %vm281_vm0, %v277_v34 }
  0x2a   : > { %382 = vmatprep.mubr.f32.mxu0 %v884_v0 }
  0x2d   : > { %795 = vmatmul.mubr.msk.f32.gmra.mrb[6].mxu0 %vm281_vm0, %v278_v35 }
  0x2e   : > { %388 = vmatprep.mubr.f32.mxu0 %v884_v0 }
  0x31   : > { %796 = vmatmul.mubr.msk.f32.gmra.mrb[8].mxu0 %vm281_vm0, %v279_v36 }
  0x32   : > { %394 = vmatprep.mubr.f32.mxu0 %v884_v0 }
  0x35   : > { %797 = vmatmul.mubr.msk.f32.gmra.mrb[10].mxu0 %vm281_vm0, %v280_v37 }
  0x88   : > { %v410_v38 = vpop.permute.xlu0 %409  ;;  %v458_v39 = vpop.permute.xlu1 %457 }
  0x8c   : > { %v415_v40 = vpop.permute.xlu0 %414  ;;  %v463_v41 = vpop.permute.xlu1 %462 }
  0x90   : > { %v420_v45 = vpop.permute.xlu0 %419  ;;  %v425_v47 = vpop.permute.xlu1 %424 }
  0x94   : > { %v473_v62 = vpop.permute.xlu1 %472 }
  0x95   : > { %v468_v55 = vpop.permute.xlu0 %467 }
  0x98   : > { %v435_v13 = vpop.permute.xlu1 %434 }
  0x99   : > { %v430_v9 = vpop.permute.xlu0 %429 }
  0x9c   : > { %v483_v30 = vpop.permute.xlu1 %482 }
  0x9d   : > { %v478_v24 = vpop.permute.xlu0 %477 }
  0xf4   : > { %v366_v42 = vpop.f32.mrb[0].mxu0 }
  0xf5   : > { %v437_v43 = vmul.f32 %v410_v38, %v366_v42  ;;  %v368_v44 = vpop.f32.mrb[1].mxu0  ;;  %v510_v42 = vld [vmem:[%s1065_s4 + $0x8] sm:$0xff] }
  0xf6   : > { %v438_v46 = vmul.f32 %v410_v38, %v368_v44  ;;  %v512_v44 = vld [vmem:[%s1065_s4 + $0x18] sm:$0xff] }
  0xf7   : > { %v485_v49 = vadd.f32 %v458_v39, %v437_v43  ;;  %v511_v43 = vld [vmem:[%s1065_s4 + $0x10] sm:$0xff] }
  0xf8   : > { %v372_v48 = vpop.f32.mrb[2].mxu0  ;;  %v486_v53 = vadd.f32 %v458_v39, %v438_v46  ;;  %v514_v46 = vld [vmem:[%s1065_s4 + $0x28] sm:$0xff] }
  0xf9   : > { %v439_v50 = vmul.f32 %v415_v40, %v372_v48  ;;  %v374_v51 = vpop.f32.mrb[3].mxu0  ;;  %v497_v58 = vmax.f32 %v485_v49, 0.0 }
  0xfa   : > { %v440_v52 = vmul.f32 %v415_v40, %v374_v51  ;;  %v498_v1 = vmax.f32 %v486_v53, 0.0 }
  0xfb   : > { %v487_v54 = vadd.f32 %v463_v41, %v439_v50 }
  0xfc   : > { %v378_v56 = vpop.f32.mrb[4].mxu0  ;;  %v488_v57 = vadd.f32 %v463_v41, %v440_v52  ;;  %v509_v41 = vld [vmem:[%s1065_s4] sm:$0xff] }
  0xfd   : > { %v499_v59 = vmax.f32 %v487_v54, 0.0  ;;  %v441_v60 = vmul.f32 %v420_v45, %v378_v56  ;;  %v380_v61 = vpop.f32.mrb[5].mxu0 }
  0xfe   : > { %v442_v63 = vmul.f32 %v420_v45, %v380_v61  ;;  %v500_v2 = vmax.f32 %v488_v57, 0.0  ;;  %v513_v45 = vld [vmem:[%s1065_s4 + $0x20] sm:$0xff] }
  0xff   : > { %v820_v3 = vpack.c.bf16 %v499_v59, %v497_v58  ;;  %v489_v6 = vadd.f32 %v468_v55, %v441_v60 }
 0x100   : > { %v384_v4 = vpop.f32.mrb[6].mxu0  ;;  %v818_v5 = vpack.c.bf16 %v500_v2, %v498_v1  ;;  %v490_v10 = vadd.f32 %v468_v55, %v442_v63 }
 0x101   : > { %v443_v7 = vmul.f32 %v425_v47, %v384_v4  ;;  %v386_v8 = vpop.f32.mrb[7].mxu0  ;;  %v501_v16 = vmax.f32 %v489_v6, 0.0 }
 0x102   : > { %v444_v11 = vmul.f32 %v425_v47, %v386_v8  ;;  %819 = vmatprep.subr.bf16.mxu1 %v818_v5  ;;  %v502_v20 = vmax.f32 %v490_v10, 0.0 }
 0x103   : > { %v491_v12 = vadd.f32 %v473_v62, %v443_v7  ;;  %821 = vmatpush1.bf16.msra.mxu1 %v820_v3 }
 0x104   : > { %v492_v14 = vadd.f32 %v473_v62, %v444_v11  ;;  %v390_v15 = vpop.f32.mrb[8].mxu0 }
 0x105   : > { %v503_v17 = vmax.f32 %v491_v12, 0.0  ;;  %v445_v18 = vmul.f32 %v430_v9, %v390_v15  ;;  %v392_v19 = vpop.f32.mrb[9].mxu0 }
 0x106   : > { %v504_v21 = vmax.f32 %v492_v14, 0.0  ;;  %v446_v22 = vmul.f32 %v430_v9, %v392_v19 }
 0x107   : > { %v824_v23 = vpack.c.bf16 %v503_v17, %v501_v16  ;;  %v493_v27 = vadd.f32 %v478_v24, %v445_v18 }
 0x108   : > { %v396_v25 = vpop.f32.mrb[10].mxu0  ;;  %v822_v26 = vpack.c.bf16 %v504_v21, %v502_v20  ;;  %v494_v31 = vadd.f32 %v478_v24, %v446_v22 }
 0x109   : > { %v447_v28 = vmul.f32 %v435_v13, %v396_v25  ;;  %v398_v29 = vpop.f32.mrb[11].mxu0  ;;  %v505_v35 = vmax.f32 %v493_v27, 0.0 }
 0x10a   : > { %v448_v32 = vmul.f32 %v435_v13, %v398_v29  ;;  %823 = vmatprep.subr.bf16.mxu1 %v822_v26  ;;  %v506_v37 = vmax.f32 %v494_v31, 0.0 }
 0x10b   : > { %v495_v33 = vadd.f32 %v483_v30, %v447_v28  ;;  %825 = vmatpush1.bf16.msra.mxu1 %v824_v23 }
 0x10c   : > { %v496_v34 = vadd.f32 %v483_v30, %v448_v32 }
 0x10d   : > { %v507_v36 = vmax.f32 %v495_v33, 0.0 }
 0x10e   : > { %v508_v38 = vmax.f32 %v496_v34, 0.0 }
 0x10f   : > { %v828_v39 = vpack.c.bf16 %v507_v36, %v505_v35 }
 0x110   : > { %v826_v40 = vpack.c.bf16 %v508_v38, %v506_v37 }
 0x112   : > { %827 = vmatprep.subr.bf16.mxu1 %v826_v40 }
 0x113   : > { %829 = vmatpush1.bf16.msra.mxu1 %v828_v39 }
 0x116   : > { %798 = vmatmul.mubr.msk.f32.vlgmr.msra.gmra.mrb[0].mxu1 %vm281_vm0, %v509_v41 }
 0x117   : > { %603 = vmatprep.mubr.f32.mxu1 %v884_v0 }
 0x11a   : > { %799 = vmatmul.mubr.msk.f32.gmra.mrb[2].mxu1 %vm281_vm0, %v510_v42 }
 0x11b   : > { %609 = vmatprep.mubr.f32.mxu1 %v884_v0 }
 0x11e   : > { %800 = vmatmul.mubr.msk.f32.gmra.mrb[4].mxu1 %vm281_vm0, %v511_v43 }
 0x11f   : > { %615 = vmatprep.mubr.f32.mxu1 %v884_v0 }
 0x122   : > { %801 = vmatmul.mubr.msk.f32.gmra.mrb[6].mxu1 %vm281_vm0, %v512_v44 }
 0x123   : > { %621 = vmatprep.mubr.f32.mxu1 %v884_v0 }
 0x126   : > { %802 = vmatmul.mubr.msk.f32.gmra.mrb[8].mxu1 %vm281_vm0, %v513_v45 }
 0x127   : > { %627 = vmatprep.mubr.f32.mxu1 %v884_v0 }
 0x12a   : > { %803 = vmatmul.mubr.msk.f32.gmra.mrb[10].mxu1 %vm281_vm0, %v514_v46 }
 0x1e9   : > { %v599_v47 = vpop.f32.mrb[0].mxu1 }
 0x1ea   : > { %v652_v48 = vmul.f32 %v599_v47, %v599_v47  ;;  %v601_v49 = vpop.f32.mrb[1].mxu1 }
 0x1eb   : > { %v653_v50 = vmul.f32 %v601_v49, %v601_v49  ;;  %v634_v51 = vadd.f32 %v601_v49, %v599_v47 }
 0x1ed   : > { %635 = vadd.xlane.f32.xlu0 %v634_v51  ;;  %v605_v52 = vpop.f32.mrb[2].mxu1  ;;  %v664_v53 = vadd.f32 %v653_v50, %v652_v48 }
 0x1ee   : > { %v654_v54 = vmul.f32 %v605_v52, %v605_v52  ;;  %v607_v55 = vpop.f32.mrb[3].mxu1 }
 0x1ef   : > { %v655_v56 = vmul.f32 %v607_v55, %v607_v55  ;;  %665 = vadd.xlane.f32.xlu1 %v664_v53  ;;  %v637_v57 = vadd.f32 %v607_v55, %v605_v52 }
 0x1f1   : > { %v611_v0 = vpop.f32.mrb[4].mxu1  ;;  %v667_v58 = vadd.f32 %v655_v56, %v654_v54 }
 0x1f2   : > { %v656_v59 = vmul.f32 %v611_v0, %v611_v0  ;;  %v613_v60 = vpop.f32.mrb[5].mxu1 }
 0x1f3   : > { %v657_v61 = vmul.f32 %v613_v60, %v613_v60  ;;  %668 = vadd.xlane.f32.xlu0 %v667_v58  ;;  %638 = vadd.xlane.f32.xlu1 %v637_v57  ;;  %v640_v62 = vadd.f32 %v613_v60, %v611_v0 }
 0x1f5   : > { %v617_v63 = vpop.f32.mrb[6].mxu1  ;;  %v670_v1 = vadd.f32 %v657_v61, %v656_v59 }
 0x1f6   : > { %v658_v2 = vmul.f32 %v617_v63, %v617_v63  ;;  %v619_v3 = vpop.f32.mrb[7].mxu1 }
 0x1f7   : > { %671 = vadd.xlane.f32.xlu1 %v670_v1  ;;  %641 = vadd.xlane.f32.xlu0 %v640_v62  ;;  %v659_v4 = vmul.f32 %v619_v3, %v619_v3  ;;  %v643_v5 = vadd.f32 %v619_v3, %v617_v63 }
 0x1f9   : > { %v623_v6 = vpop.f32.mrb[8].mxu1  ;;  %v673_v7 = vadd.f32 %v659_v4, %v658_v2 }
 0x1fa   : > { %v660_v8 = vmul.f32 %v623_v6, %v623_v6  ;;  %v625_v9 = vpop.f32.mrb[9].mxu1 }
 0x1fb   : > { %v661_v10 = vmul.f32 %v625_v9, %v625_v9  ;;  %644 = vadd.xlane.f32.xlu0 %v643_v5  ;;  %v646_v11 = vadd.f32 %v625_v9, %v623_v6 }
 0x1fd   : > { %647 = vadd.xlane.f32.xlu1 %v646_v11  ;;  %v629_v12 = vpop.f32.mrb[10].mxu1  ;;  %v676_v13 = vadd.f32 %v661_v10, %v660_v8 }
 0x1fe   : > { %v662_v14 = vmul.f32 %v629_v12, %v629_v12  ;;  %v631_v15 = vpop.f32.mrb[11].mxu1 }
 0x1ff   : > { %674 = vadd.xlane.f32.xlu0 %v673_v7  ;;  %v649_v16 = vadd.f32 %v631_v15, %v629_v12  ;;  %v663_v17 = vmul.f32 %v631_v15, %v631_v15 }
 0x201   : > { %677 = vadd.xlane.f32.xlu1 %v676_v13  ;;  %v679_v18 = vadd.f32 %v663_v17, %v662_v14 }
 0x203   : > { %650 = vadd.xlane.f32.xlu0 %v649_v16 }
 0x207   : > { %680 = vadd.xlane.f32.xlu0 %v679_v18 }
 0x27a   : > { %v636_v19 = vpop.xlane.xlu0 %635 }
 0x27c   : > { %v666_v20 = vpop.xlane.xlu1 %665 }
 0x27d   : > { %v683_v21 = vsel %vm682_vm1, %v636_v19, %v666_v20 }
 0x27e   : > { %690 = vst.msk [vmem:[%s262_s10] sm:$0xff] %vm689_vm2, %v683_v21 }
 0x280   : > { %v669_v22 = vpop.xlane.xlu0 %668  ;;  %v639_v23 = vpop.xlane.xlu1 %638 }
 0x281   : > { %v684_v24 = vsel %vm682_vm1, %v639_v23, %v669_v22 }
 0x282   : > { %691 = vst.msk [vmem:[%s262_s10 + $0x8] sm:$0xff] %vm689_vm2, %v684_v24 }
 0x284   : > { %v672_v25 = vpop.xlane.xlu1 %671  ;;  %v642_v26 = vpop.xlane.xlu0 %641 }
 0x285   : > { %v685_v27 = vsel %vm682_vm1, %v642_v26, %v672_v25 }
 0x286   : > { %692 = vst.msk [vmem:[%s262_s10 + $0x10] sm:$0xff] %vm689_vm2, %v685_v27 }
 0x288   : > { %v645_v28 = vpop.xlane.xlu0 %644 }
 0x28a   : > { %v648_v29 = vpop.xlane.xlu1 %647 }
 0x28c   : > { %v675_v30 = vpop.xlane.xlu0 %674 }
 0x28d   : > { %v686_v31 = vsel %vm682_vm1, %v645_v28, %v675_v30 }
 0x28e   : > { %693 = vst.msk [vmem:[%s262_s10 + $0x18] sm:$0xff] %vm689_vm2, %v686_v31  ;;  %v678_v32 = vpop.xlane.xlu1 %677 }
 0x28f   : > { %v687_v33 = vsel %vm682_vm1, %v648_v29, %v678_v32 }
 0x290   : > { %694 = vst.msk [vmem:[%s262_s10 + $0x20] sm:$0xff] %vm689_vm2, %v687_v33  ;;  %v651_v34 = vpop.xlane.xlu0 %650 }
 0x294   : > { %v681_v35 = vpop.xlane.xlu0 %680 }
 0x295   : > { %v688_v36 = vsel %vm682_vm1, %v651_v34, %v681_v35 }
 0x296   : > { %695 = vst.msk [vmem:[%s262_s10 + $0x28] sm:$0xff] %vm689_vm2, %v688_v36 }
 0x297 PF: > { %s15_s20 = sadd.s32 1, %s882_s20   ;;  %s1067_s18 = smov %s878_s19 }
 0x298   : > { %p12_p5 = scmp.ge.s32.totalorder %s15_s20, 4   ;;  %s1068_s19 = smov %s1070_s21 }
 0x29a   :  { %14 = sbr.rel (!%p12_p5) target bundleno = 2 (0x2), region = 70 }

// kernel: residual_block_pallas.5
= control target key start
LH: loop header
LB: loop body
LE: loop exit
PB: predicated region body
PF: predicated region fallthrough
CT: control target
= control target key end

     0   :  { %s1036_s24 = smov 0   ;;  %s1038_s25 = smov 0   ;;  %s1270_s0 = inlined_call_operand.vmem [shape: f32[2,48,256], index: 0, kind: input, shape index: {}]   ;;  %s1271_s1 = inlined_call_operand.vmem [shape: f32[48,48], index: 1, kind: input, shape index: {}]   ;;  %s1272_s2 = inlined_call_operand.vmem [shape: f32[48,1], index: 2, kind: input, shape index: {}]   ;;  %s1273_s3 = inlined_call_operand.vmem [shape: f32[48,1], index: 3, kind: input, shape index: {}]   ;;  %s1274_s4 = inlined_call_operand.vmem [shape: f32[48,48], index: 4, kind: input, shape index: {}]   ;;  %s1275_s5 = inlined_call_operand.vmem [shape: f32[48,1], index: 5, kind: input, shape index: {}]   ;;  %s1276_s6 = inlined_call_operand.vmem [shape: f32[48,1], index: 6, kind: input, shape index: {}]   ;;  %s1277_s7 = inlined_call_operand.vmem [shape: f32[2,48,256], index: 7, kind: output, shape index: {}]  }
   0x1   :  { %s1040_s26 = smov 0  }
   0x2 LB: > { %s29_s27 = sadd.s32 1, %s988_s25  ;;  %p900_p0 = scmp.ge.s32.totalorder %s992_s26, 1  ;;  %s992_s26 = sphi %s1040_s26, %s17_s26   ;;  %s988_s25 = sphi %s1038_s25, %s1279_s25   ;;  %s984_s24 = sphi %s1036_s24, %s1278_s24  }
   0x3   : > { %p31_p1 = scmp.ge.s32.totalorder %s29_s27, 2  ;;  %p258_p2 = scmp.lt.s32.totalorder %s992_s26, 3 }
   0x5   : > { %s1281_s27 = smov (%p31_p1, %s29_s27), 0  ;;  %p259_p3 = pnand %p900_p0, %p258_p2 }
   0x6   : > { %p299_p4 = scmp.lt.s32.totalorder (!%p259_p3), %s984_s24, 1  ;;  %v994_v0 = vmov (!%p259_p3), 0.0   ;;  %v995_v1 = vmov (!%p259_p3), 0   ;;  %v504_v2 = vld [vmem:[%s1273_s3] sm:$0xff] (!%p259_p3)  ;;  %v505_v4 = vld [vmem:[%s1273_s3 + $0x8] sm:$0xff] (!%p259_p3)  ;;  %v459_v6 = vld [vmem:[%s1272_s2 + $0x18] sm:$0xff] (!%p259_p3) }
   0x7   : > { %262 = sbr.rel (%p259_p3) target bundleno = 518 (0x206), region = 48  ;;  %419 = vmatprep.mubr.f32.mxu0 (!%p259_p3), %v994_v0  ;;  %652 = vmatprep.mubr.f32.mxu1 (!%p259_p3), %v994_v0  ;;  %v456_v3 = vld [vmem:[%s1272_s2] sm:$0xff] (!%p259_p3)  ;;  %v457_v5 = vld [vmem:[%s1272_s2 + $0x8] sm:$0xff] (!%p259_p3)  ;;  %v458_v10 = vld [vmem:[%s1272_s2 + $0x10] sm:$0xff] (!%p259_p3)  ;;  %vm336_vm0 = vcmask (!%p259_p3), 392192  }
   0x8   : > { %969 = vset.pattern.permute.xlu1 (!%p259_p3), %v995_v1  ;;  %968 = vset.pattern.permute.xlu0 (!%p259_p3), %v995_v1  ;;  %v507_v25 = vld [vmem:[%s1273_s3 + $0x18] sm:$0xff] (!%p259_p3)  ;;  %v506_v26 = vld [vmem:[%s1273_s3 + $0x10] sm:$0xff] (!%p259_p3)  ;;  %v461_v28 = vld [vmem:[%s1272_s2 + $0x28] sm:$0xff] (!%p259_p3) }
   0x9   : > { %512 = vperm.xlu1 (!%p259_p3), %969, %v504_v2   ;;  %464 = vperm.xlu0 (!%p259_p3), %968, %v456_v3   ;;  %v460_v29 = vld [vmem:[%s1272_s2 + $0x20] sm:$0xff] (!%p259_p3)  ;;  %v509_v31 = vld [vmem:[%s1273_s3 + $0x28] sm:$0xff] (!%p259_p3)  ;;  %v332_v36 = vld [vmem:[%s1271_s1 + $0x10] sm:$0xff] (!%p259_p3) }
   0xa   : > { %v330_v30 = vld [vmem:[%s1271_s1] sm:$0xff] (!%p259_p3)  ;;  %v331_v33 = vld [vmem:[%s1271_s1 + $0x8] sm:$0xff] (!%p259_p3)  ;;  %v692_v37 = vld [vmem:[%s1275_s5 + $0x18] sm:$0xff] (!%p259_p3) }
   0xb   : > { %v508_v32 = vld [vmem:[%s1273_s3 + $0x20] sm:$0xff] (!%p259_p3)  ;;  %v690_v34 = vld [vmem:[%s1275_s5 + $0x8] sm:$0xff] (!%p259_p3)  ;;  %v691_v38 = vld [vmem:[%s1275_s5 + $0x10] sm:$0xff] (!%p259_p3) }
   0xc   : > { %v689_v35 = vld [vmem:[%s1275_s5] sm:$0xff] (!%p259_p3)  ;;  %v333_v39 = vld [vmem:[%s1271_s1 + $0x18] sm:$0xff] (!%p259_p3)  ;;  %v694_v40 = vld [vmem:[%s1275_s5 + $0x28] sm:$0xff] (!%p259_p3) }
   0xd   : > { %517 = vperm.xlu1 (!%p259_p3), %969, %v505_v4   ;;  %469 = vperm.xlu0 (!%p259_p3), %968, %v457_v5   ;;  %v693_v41 = vld [vmem:[%s1275_s5 + $0x20] sm:$0xff] (!%p259_p3)  ;;  %v738_v43 = vld [vmem:[%s1276_s6 + $0x8] sm:$0xff] (!%p259_p3)  ;;  %v740_v46 = vld [vmem:[%s1276_s6 + $0x18] sm:$0xff] (!%p259_p3) }
   0xe   : > { %s1283_s24 = smov (!%p299_p4, %s984_s24), 1  ;;  %v334_v42 = vld [vmem:[%s1271_s1 + $0x20] sm:$0xff]  ;;  %v335_v45 = vld [vmem:[%s1271_s1 + $0x28] sm:$0xff]  ;;  %v739_v47 = vld [vmem:[%s1276_s6 + $0x10] sm:$0xff] }
   0xf   : > { %s941_s9 = smul.u32 96, %s1283_s24  ;;  %v737_v44 = vld [vmem:[%s1276_s6] sm:$0xff]  ;;  %v742_v48 = vld [vmem:[%s1276_s6 + $0x28] sm:$0xff] }
  0x10   : > { %v741_v49 = vld [vmem:[%s1276_s6 + $0x20] sm:$0xff] }
  0x11   : > { %s306_s16 = scalar_lea.vmem %s1270_s0, %s941_s9  ;;  %479 = vperm.xlu1 %969, %v459_v6   ;;  %474 = vperm.xlu0 %968, %v458_v10   ;;  %s1235_s11 = scalar_lea.vmem %s1277_s7, %s941_s9 }
  0x12   : > { %v1079_v7 = vld [vmem:[%s306_s16 + $0x8] sm:$0xff]  ;;  %v1081_v8 = vld [vmem:[%s306_s16 + $0x18] sm:$0xff]  ;;  %v1083_v9 = vld [vmem:[%s306_s16] sm:$0xff] }
  0x13   : > { %v917_v11 = vpack.c.bf16 %v1081_v8, %v1079_v7  ;;  %v1090_v12 = vld [vmem:[%s306_s16 + $0x10] sm:$0xff]  ;;  %v1092_v13 = vld [vmem:[%s306_s16 + $0x28] sm:$0xff]  ;;  %v1094_v14 = vld [vmem:[%s306_s16 + $0x38] sm:$0xff] }
  0x14   : > { %v919_v15 = vpack.c.bf16 %v1090_v12, %v1083_v9  ;;  %v921_v16 = vpack.c.bf16 %v1094_v14, %v1092_v13  ;;  %v1100_v17 = vld [vmem:[%s306_s16 + $0x20] sm:$0xff]  ;;  %v1102_v18 = vld [vmem:[%s306_s16 + $0x30] sm:$0xff]  ;;  %v1104_v19 = vld [vmem:[%s306_s16 + $0x48] sm:$0xff] }
  0x15   : > { %918 = vmatprep.subr.bf16.mxu0 %v917_v11  ;;  %v1106_v20 = vld [vmem:[%s306_s16 + $0x58] sm:$0xff]  ;;  %v923_v21 = vpack.c.bf16 %v1102_v18, %v1100_v17  ;;  %v1112_v23 = vld [vmem:[%s306_s16 + $0x40] sm:$0xff]  ;;  %v1114_v24 = vld [vmem:[%s306_s16 + $0x50] sm:$0xff]  ;;  %527 = vperm.xlu1 %969, %v507_v25  }
  0x16   : > { %920 = vmatpush1.bf16.msra.mxu0 %v919_v15  ;;  %v925_v22 = vpack.c.bf16 %v1106_v20, %v1104_v19  ;;  %v927_v27 = vpack.c.bf16 %v1114_v24, %v1112_v23  ;;  %522 = vperm.xlu0 %968, %v506_v26  }
  0x17   : > { %922 = vmatprep.subr.bf16.mxu0 %v921_v16 }
  0x19   : > { %489 = vperm.xlu1 %969, %v461_v28  }
  0x1a   : > { %924 = vmatpush1.bf16.msra.mxu0 %v923_v21  ;;  %484 = vperm.xlu0 %968, %v460_v29  }
  0x1b   : > { %926 = vmatprep.subr.bf16.mxu0 %v925_v22 }
  0x1d   : > { %537 = vperm.xlu1 %969, %v509_v31  }
  0x1e   : > { %928 = vmatpush1.bf16.msra.mxu0 %v927_v27  ;;  %532 = vperm.xlu0 %968, %v508_v32  }
  0x21   : > { %903 = vmatmul.mubr.msk.f32.vlgmr.msra.gmra.mrb[0].mxu0 %vm336_vm0, %v330_v30  ;;  %702 = vperm.xlu1 %969, %v690_v34  }
  0x22   : > { %425 = vmatprep.mubr.f32.mxu0 %v994_v0  ;;  %697 = vperm.xlu0 %968, %v689_v35  }
  0x25   : > { %904 = vmatmul.mubr.msk.f32.gmra.mrb[2].mxu0 %vm336_vm0, %v331_v33  ;;  %712 = vperm.xlu1 %969, %v692_v37  }
  0x26   : > { %431 = vmatprep.mubr.f32.mxu0 %v994_v0  ;;  %707 = vperm.xlu0 %968, %v691_v38  }
  0x29   : > { %905 = vmatmul.mubr.msk.f32.gmra.mrb[4].mxu0 %vm336_vm0, %v332_v36  ;;  %722 = vperm.xlu1 %969, %v694_v40  }
  0x2a   : > { %437 = vmatprep.mubr.f32.mxu0 %v994_v0  ;;  %717 = vperm.xlu0 %968, %v693_v41  }
  0x2d   : > { %906 = vmatmul.mubr.msk.f32.gmra.mrb[6].mxu0 %vm336_vm0, %v333_v39  ;;  %750 = vperm.xlu1 %969, %v738_v43  }
  0x2e   : > { %443 = vmatprep.mubr.f32.mxu0 %v994_v0  ;;  %745 = vperm.xlu0 %968, %v737_v44  }
  0x31   : > { %907 = vmatmul.mubr.msk.f32.gmra.mrb[8].mxu0 %vm336_vm0, %v334_v42  ;;  %760 = vperm.xlu1 %969, %v740_v46  }
  0x32   : > { %449 = vmatprep.mubr.f32.mxu0 %v994_v0  ;;  %755 = vperm.xlu0 %968, %v739_v47  }
  0x35   : > { %908 = vmatmul.mubr.msk.f32.gmra.mrb[10].mxu0 %vm336_vm0, %v335_v45  ;;  %770 = vperm.xlu1 %969, %v742_v48  }
  0x36   : > { %765 = vperm.xlu0 %968, %v741_v49  }
  0x88   : > { %v465_v50 = vpop.permute.xlu0 %464  ;;  %v513_v51 = vpop.permute.xlu1 %512 }
  0x8c   : > { %v470_v52 = vpop.permute.xlu0 %469  ;;  %v518_v53 = vpop.permute.xlu1 %517 }
  0x90   : > { %v475_v57 = vpop.permute.xlu0 %474  ;;  %v480_v59 = vpop.permute.xlu1 %479 }
  0x94   : > { %v528_v21 = vpop.permute.xlu1 %527 }
  0x95   : > { %v523_v4 = vpop.permute.xlu0 %522 }
  0x98   : > { %v490_v37 = vpop.permute.xlu1 %489 }
  0x99   : > { %v485_v33 = vpop.permute.xlu0 %484 }
  0x9d   : > { %v533_v48 = vpop.permute.xlu0 %532 }
  0xf4   : > { %v421_v54 = vpop.f32.mrb[0].mxu0 }
  0xf5   : > { %v492_v55 = vmul.f32 %v465_v50, %v421_v54  ;;  %v423_v56 = vpop.f32.mrb[1].mxu0  ;;  %v538_v54 = vpop.permute.xlu1 %537 }
  0xf6   : > { %v493_v58 = vmul.f32 %v465_v50, %v423_v56 }
  0xf7   : > { %v540_v61 = vadd.f32 %v513_v51, %v492_v55 }
  0xf8   : > { %v427_v60 = vpop.f32.mrb[2].mxu0  ;;  %v541_v2 = vadd.f32 %v513_v51, %v493_v58 }
  0xf9   : > { %v494_v62 = vmul.f32 %v470_v52, %v427_v60  ;;  %v429_v63 = vpop.f32.mrb[3].mxu0  ;;  %v552_v10 = vmax.f32 %v540_v61, 0.0 }
  0xfa   : > { %v495_v1 = vmul.f32 %v470_v52, %v429_v63  ;;  %v553_v25 = vmax.f32 %v541_v2, 0.0  ;;  %v564_v2 = vld [vmem:[%s1274_s4] sm:$0xff] }
  0xfb   : > { %v542_v3 = vadd.f32 %v518_v53, %v494_v62 }
  0xfc   : > { %v433_v5 = vpop.f32.mrb[4].mxu0  ;;  %v543_v6 = vadd.f32 %v518_v53, %v495_v1 }
  0xfd   : > { %v554_v11 = vmax.f32 %v542_v3, 0.0  ;;  %v496_v15 = vmul.f32 %v475_v57, %v433_v5  ;;  %v435_v16 = vpop.f32.mrb[5].mxu0  ;;  %v565_v3 = vld [vmem:[%s1274_s4 + $0x8] sm:$0xff]  ;;  %v567_v5 = vld [vmem:[%s1274_s4 + $0x18] sm:$0xff] }
  0xfe   : > { %v497_v22 = vmul.f32 %v475_v57, %v435_v16  ;;  %v555_v26 = vmax.f32 %v543_v6, 0.0  ;;  %v568_v6 = vld [vmem:[%s1274_s4 + $0x20] sm:$0xff] }
  0xff   : > { %v931_v27 = vpack.c.bf16 %v554_v11, %v552_v10  ;;  %v544_v30 = vadd.f32 %v523_v4, %v496_v15  ;;  %v569_v10 = vld [vmem:[%s1274_s4 + $0x28] sm:$0xff]  ;;  %v698_v11 = vpop.permute.xlu0 %697  ;;  %v703_v15 = vpop.permute.xlu1 %702 }
 0x100   : > { %v439_v28 = vpop.f32.mrb[6].mxu0  ;;  %v929_v29 = vpack.c.bf16 %v555_v26, %v553_v25  ;;  %v545_v34 = vadd.f32 %v523_v4, %v497_v22  ;;  %v566_v4 = vld [vmem:[%s1274_s4 + $0x10] sm:$0xff] }
 0x101   : > { %v498_v31 = vmul.f32 %v480_v59, %v439_v28  ;;  %v441_v32 = vpop.f32.mrb[7].mxu0  ;;  %v556_v40 = vmax.f32 %v544_v30, 0.0 }
 0x102   : > { %v499_v35 = vmul.f32 %v480_v59, %v441_v32  ;;  %930 = vmatprep.subr.bf16.mxu1 %v929_v29  ;;  %v557_v44 = vmax.f32 %v545_v34, 0.0 }
 0x103   : > { %v546_v36 = vadd.f32 %v528_v21, %v498_v31  ;;  %932 = vmatpush1.bf16.msra.mxu1 %v931_v27  ;;  %v708_v16 = vpop.permute.xlu0 %707 }
 0x104   : > { %v547_v38 = vadd.f32 %v528_v21, %v499_v35  ;;  %v445_v39 = vpop.f32.mrb[8].mxu0  ;;  %v713_v21 = vpop.permute.xlu1 %712 }
 0x105   : > { %v558_v41 = vmax.f32 %v546_v36, 0.0  ;;  %v500_v42 = vmul.f32 %v485_v33, %v445_v39  ;;  %v447_v43 = vpop.f32.mrb[9].mxu0 }
 0x106   : > { %v559_v45 = vmax.f32 %v547_v38, 0.0  ;;  %v501_v46 = vmul.f32 %v485_v33, %v447_v43 }
 0x107   : > { %v935_v47 = vpack.c.bf16 %v558_v41, %v556_v40  ;;  %v548_v51 = vadd.f32 %v533_v48, %v500_v42  ;;  %v718_v22 = vpop.permute.xlu0 %717 }
 0x108   : > { %v451_v49 = vpop.f32.mrb[10].mxu0  ;;  %v933_v50 = vpack.c.bf16 %v559_v45, %v557_v44  ;;  %v549_v55 = vadd.f32 %v533_v48, %v501_v46  ;;  %v723_v25 = vpop.permute.xlu1 %722 }
 0x109   : > { %v502_v52 = vmul.f32 %v490_v37, %v451_v49  ;;  %v453_v53 = vpop.f32.mrb[11].mxu0  ;;  %v560_v59 = vmax.f32 %v548_v51, 0.0 }
 0x10a   : > { %v503_v56 = vmul.f32 %v490_v37, %v453_v53  ;;  %934 = vmatprep.subr.bf16.mxu1 %v933_v50  ;;  %v561_v61 = vmax.f32 %v549_v55, 0.0 }
 0x10b   : > { %v550_v57 = vadd.f32 %v538_v54, %v502_v52  ;;  %936 = vmatpush1.bf16.msra.mxu1 %v935_v47  ;;  %v746_v29 = vpop.permute.xlu0 %745 }
 0x10c   : > { %v551_v58 = vadd.f32 %v538_v54, %v503_v56  ;;  %v751_v36 = vpop.permute.xlu1 %750 }
 0x10d   : > { %v562_v60 = vmax.f32 %v550_v57, 0.0 }
 0x10e   : > { %v563_v62 = vmax.f32 %v551_v58, 0.0 }
 0x10f   : > { %v939_v63 = vpack.c.bf16 %v562_v60, %v560_v59  ;;  %v756_v45 = vpop.permute.xlu0 %755 }
 0x110   : > { %v937_v1 = vpack.c.bf16 %v563_v62, %v561_v61  ;;  %v761_v52 = vpop.permute.xlu1 %760 }
 0x112   : > { %938 = vmatprep.subr.bf16.mxu1 %v937_v1 }
 0x113   : > { %940 = vmatpush1.bf16.msra.mxu1 %v939_v63  ;;  %v766_v59 = vpop.permute.xlu0 %765 }
 0x116   : > { %909 = vmatmul.mubr.msk.f32.vlgmr.msra.gmra.mrb[0].mxu1 %vm336_vm0, %v564_v2 }
 0x117   : > { %658 = vmatprep.mubr.f32.mxu1 %v994_v0 }
 0x11a   : > { %910 = vmatmul.mubr.msk.f32.gmra.mrb[2].mxu1 %vm336_vm0, %v565_v3 }
 0x11b   : > { %664 = vmatprep.mubr.f32.mxu1 %v994_v0 }
 0x11e   : > { %911 = vmatmul.mubr.msk.f32.gmra.mrb[4].mxu1 %vm336_vm0, %v566_v4 }
 0x11f   : > { %670 = vmatprep.mubr.f32.mxu1 %v994_v0 }
 0x122   : > { %912 = vmatmul.mubr.msk.f32.gmra.mrb[6].mxu1 %vm336_vm0, %v567_v5 }
 0x123   : > { %676 = vmatprep.mubr.f32.mxu1 %v994_v0 }
 0x126   : > { %913 = vmatmul.mubr.msk.f32.gmra.mrb[8].mxu1 %vm336_vm0, %v568_v6 }
 0x127   : > { %682 = vmatprep.mubr.f32.mxu1 %v994_v0 }
 0x12a   : > { %914 = vmatmul.mubr.msk.f32.gmra.mrb[10].mxu1 %vm336_vm0, %v569_v10 }
 0x1e9   : > { %v654_v26 = vpop.f32.mrb[0].mxu1 }
 0x1ea   : > { %v725_v27 = vmul.f32 %v698_v11, %v654_v26  ;;  %v656_v28 = vpop.f32.mrb[1].mxu1 }
 0x1eb   : > { %v726_v30 = vmul.f32 %v698_v11, %v656_v28 }
 0x1ec   : > { %v773_v31 = vadd.f32 %v746_v29, %v725_v27 }
 0x1ed   : > { %v774_v0 = vadd.f32 %v746_v29, %v726_v30  ;;  %v660_v32 = vpop.f32.mrb[2].mxu1 }
 0x1ee   : > { %v785_v33 = vadd.f32 %v773_v31, %v1083_v9  ;;  %v727_v34 = vmul.f32 %v703_v15, %v660_v32  ;;  %v662_v35 = vpop.f32.mrb[3].mxu1 }
 0x1ef   : > { %v786_v37 = vadd.f32 %v774_v0, %v1079_v7  ;;  %v728_v38 = vmul.f32 %v703_v15, %v662_v35 }
 0x1f0   : > { %797 = vst [vmem:[%s1235_s11] sm:$0xff] %v785_v33  ;;  %v775_v39 = vadd.f32 %v751_v36, %v727_v34 }
 0x1f1   : > { %798 = vst [vmem:[%s1235_s11 + $0x8] sm:$0xff] %v786_v37  ;;  %v776_v40 = vadd.f32 %v751_v36, %v728_v38  ;;  %v666_v41 = vpop.f32.mrb[4].mxu1 }
 0x1f2   : > { %v787_v42 = vadd.f32 %v775_v39, %v1090_v12  ;;  %v729_v43 = vmul.f32 %v708_v16, %v666_v41  ;;  %v668_v44 = vpop.f32.mrb[5].mxu1 }
 0x1f3   : > { %v788_v9 = vadd.f32 %v776_v40, %v1081_v8  ;;  %v730_v46 = vmul.f32 %v708_v16, %v668_v44 }
 0x1f4   : > { %799 = vst [vmem:[%s1235_s11 + $0x10] sm:$0xff] %v787_v42  ;;  %v777_v47 = vadd.f32 %v756_v45, %v729_v43 }
 0x1f5   : > { %800 = vst [vmem:[%s1235_s11 + $0x18] sm:$0xff] %v788_v9  ;;  %v778_v7 = vadd.f32 %v756_v45, %v730_v46  ;;  %v672_v48 = vpop.f32.mrb[6].mxu1 }
 0x1f6   : > { %v789_v49 = vadd.f32 %v777_v47, %v1100_v17  ;;  %v731_v50 = vmul.f32 %v713_v21, %v672_v48  ;;  %v674_v51 = vpop.f32.mrb[7].mxu1 }
 0x1f7   : > { %v790_v12 = vadd.f32 %v778_v7, %v1092_v13  ;;  %v732_v53 = vmul.f32 %v713_v21, %v674_v51 }
 0x1f8   : > { %801 = vst [vmem:[%s1235_s11 + $0x20] sm:$0xff] %v789_v49  ;;  %v779_v54 = vadd.f32 %v761_v52, %v731_v50 }
 0x1f9   : > { %802 = vst [vmem:[%s1235_s11 + $0x28] sm:$0xff] %v790_v12  ;;  %v780_v8 = vadd.f32 %v761_v52, %v732_v53  ;;  %v678_v55 = vpop.f32.mrb[8].mxu1 }
 0x1fa   : > { %v791_v56 = vadd.f32 %v779_v54, %v1102_v18  ;;  %v733_v57 = vmul.f32 %v718_v22, %v678_v55  ;;  %v680_v58 = vpop.f32.mrb[9].mxu1  ;;  %v771_v18 = vpop.permute.xlu1 %770 }
 0x1fb   : > { %v792_v17 = vadd.f32 %v780_v8, %v1094_v14  ;;  %v734_v60 = vmul.f32 %v718_v22, %v680_v58 }
 0x1fc   : > { %803 = vst [vmem:[%s1235_s11 + $0x30] sm:$0xff] %v791_v56  ;;  %v781_v61 = vadd.f32 %v766_v59, %v733_v57 }
 0x1fd   : > { %804 = vst [vmem:[%s1235_s11 + $0x38] sm:$0xff] %v792_v17  ;;  %v782_v13 = vadd.f32 %v766_v59, %v734_v60  ;;  %v684_v62 = vpop.f32.mrb[10].mxu1 }
 0x1fe   : > { %v793_v63 = vadd.f32 %v781_v61, %v1112_v23  ;;  %v735_v1 = vmul.f32 %v723_v25, %v684_v62  ;;  %v686_v2 = vpop.f32.mrb[11].mxu1 }
 0x1ff   : > { %v794_v3 = vadd.f32 %v782_v13, %v1104_v19  ;;  %v736_v4 = vmul.f32 %v723_v25, %v686_v2 }
 0x200   : > { %805 = vst [vmem:[%s1235_s11 + $0x40] sm:$0xff] %v793_v63  ;;  %v783_v5 = vadd.f32 %v771_v18, %v735_v1 }
 0x201   : > { %806 = vst [vmem:[%s1235_s11 + $0x48] sm:$0xff] %v794_v3  ;;  %v784_v14 = vadd.f32 %v771_v18, %v736_v4 }
 0x202   : > { %v795_v6 = vadd.f32 %v783_v5, %v1114_v24 }
 0x203   : > { %v796_v10 = vadd.f32 %v784_v14, %v1106_v20 }
 0x204   : > { %807 = vst [vmem:[%s1235_s11 + $0x50] sm:$0xff] %v795_v6 }
 0x205   : > { %808 = vst [vmem:[%s1235_s11 + $0x58] sm:$0xff] %v796_v10 }
 0x206 PF: > { %s17_s26 = sadd.s32 1, %s992_s26   ;;  %s1278_s24 = smov %s988_s25 }
 0x207   : > { %p14_p5 = scmp.ge.s32.totalorder %s17_s26, 4   ;;  %s1279_s25 = smov %s1281_s27 }
 0x209   :  { %16 = sbr.rel (!%p14_p5) target bundleno = 2 (0x2), region = 78 }

</bundles_post_ra>
